<compile_context>
chip_gen: v6e
topology: v6e:2x2x1
jax: 0.10.0
libtpu: 0.0.40
codegen_flags: <defaults>
</compile_context>

<pallas_src>
import functools
import math

import jax
import jax.numpy as jnp
from jax import lax
from jax.experimental import pallas as pl
from jax.experimental.pallas import tpu as pltpu


def _examplar_loss_kernel(latent_ref, out_ref, *, inv_sqrt_eps, tm, n, b):
    i = pl.program_id(0)

    # All keys, resident in VMEM across grid steps (constant index_map).
    x = latent_ref[...].astype(jnp.float32)                      # (N, Dp)

    # Row L2 normalization with 1/sqrt(eps) folded in (EUP rsqrt, no divide).
    # TODO(synk): rsqrt(0) -> inf/NaN on an all-zero row, matching the
    # PyTorch reference's divide-by-zero behavior (no epsilon guard added).
    k_sq = jnp.sum(x * x, axis=-1, keepdims=True)                # (N, 1)
    kn = x * (lax.rsqrt(k_sq) * inv_sqrt_eps)                    # (N, Dp)

    # Query tile: TM rows starting at i*TM (sublane-aligned start).
    row0 = pl.multiple_of(i * tm, tm)
    q = latent_ref[pl.ds(row0, tm), :].astype(jnp.float32)       # (TM, Dp)
    q_sq = jnp.sum(q * q, axis=-1, keepdims=True)
    qn = q * (lax.rsqrt(q_sq) * inv_sqrt_eps)

    # Score tile = cos_sim / eps.  Rows-by-rows contraction on the MXU
    # (contract last dim of both operands; no explicit transpose).
    s = lax.dot_general(qn, kn, (((1,), (1,)), ((), ())),
                        preferred_element_type=jnp.float32)      # (TM, N)

    # In-register masks from iota (no HBM mask traffic).
    rows = row0 + lax.broadcasted_iota(jnp.int32, (tm, n), 0)    # global row id
    cols = lax.broadcasted_iota(jnp.int32, (tm, n), 1)
    s = jnp.where(rows == cols, 0.0, s)      # S * (1 - eye), as in reference

    # Row-wise logsumexp (numerically stable).
    row_max = jnp.max(s, axis=-1, keepdims=True)
    lse = row_max + jnp.log(jnp.sum(jnp.exp(s - row_max), axis=-1,
                                    keepdims=True))              # (TM, 1)

    # Positive-pair logit: column (r + B) mod N in the concatenated layout.
    pair_col = jnp.where(rows < b, rows + b, rows - b)
    pos = jnp.sum(jnp.where(cols == pair_col, s, 0.0), axis=-1,
                  keepdims=True)                                 # (TM, 1)

    partial = jnp.sum(pos - lse)             # scalar contribution of this tile

    # Lane-dense (8, 128) partial tile: unmasked store, parallel-friendly.
    out_ref[...] = jnp.full((8, 128), partial, dtype=jnp.float32)


def examplar_loss(latent1, latent2, batch_size, eps=1.0):
    """Pallas equivalent of ExamplarLoss(batch_size).forward(latent1, latent2)."""
    b = int(batch_size)
    n = 2 * b

    l1 = latent1.reshape(b, -1).astype(jnp.float32)
    l2 = latent2.reshape(b, -1).astype(jnp.float32)
    latent = jnp.concatenate([l1, l2], axis=0)                   # (N, D)
    d = latent.shape[1]

    # Pad feature dim to a lane multiple (zeros do not change dots / norms).
    dp = ((d + 127) // 128) * 128
    if dp != d:
        latent = jnp.pad(latent, ((0, 0), (0, dp - d)))

    # Row-tile size: largest sublane-aligned divisor of N (capped at 512);
    # fall back to a single full-N block if N is not a multiple of 8.
    tm = n
    for cand in (512, 256, 128, 64, 32, 16, 8):
        if n % cand == 0:
            tm = cand
            break
    grid = n // tm

    kernel = functools.partial(
        _examplar_loss_kernel,
        inv_sqrt_eps=float(1.0 / math.sqrt(float(eps))),
        tm=tm, n=n, b=b)

    out = pl.pallas_call(
        kernel,
        out_shape=jax.ShapeDtypeStruct((grid * 8, 128), jnp.float32),
        grid=(grid,),
        in_specs=[
            pl.BlockSpec((n, dp), lambda i: (0, 0)),   # keys resident in VMEM
        ],
        out_specs=pl.BlockSpec((8, 128), lambda i: (i, 0)),
        compiler_params=pltpu.CompilerParams(
            dimension_semantics=("parallel",),
            vmem_limit_bytes=64 * 1024 * 1024),
    )(latent)

    # Each block's tile is uniformly filled with its partial sum; pick one
    # representative element per block and finish the reduction here.
    total = jnp.sum(out[::8, 0])
    return -total / n


def _reference_loss(latent1, latent2, batch_size, eps=1.0):
    """Plain-JAX reference mirroring the PyTorch forward (for verification)."""
    n = 2 * batch_size
    latent = jnp.stack([latent1.reshape(batch_size, -1),
                        latent2.reshape(batch_size, -1)], axis=1)
    latent = latent.reshape(n, -1).astype(jnp.float32)
    g = latent @ latent.T
    norm = jnp.linalg.norm(latent, axis=1)
    s = g / (eps * norm[:, None] * norm[None, :])
    s = s * (1.0 - jnp.eye(n))
    log_sm = jax.nn.log_softmax(s, axis=-1)
    idx = jnp.arange(batch_size)
    loss_mask = jnp.zeros((n, n), jnp.float32)
    loss_mask = loss_mask.at[2 * idx, 2 * idx + 1].set(1.0)
    loss_mask = loss_mask.at[2 * idx + 1, 2 * idx].set(1.0)
    return -(jnp.sum(log_sm * loss_mask) / n)


if __name__ == "__main__":
    batch_size = 4   # -> N = 8
    feat_dim = 32    # flattened latent feature dimension (padded to 128 inside)

    key = jax.random.PRNGKey(0)
    k1, k2 = jax.random.split(key)
    latent1 = jax.random.normal(k1, (batch_size, feat_dim), dtype=jnp.float32)
    latent2 = jax.random.normal(k2, (batch_size, feat_dim), dtype=jnp.float32)

    out = examplar_loss(latent1, latent2, batch_size, eps=1.0)
    out = jax.block_until_ready(out)

    ref = _reference_loss(latent1, latent2, batch_size, eps=1.0)
    assert jnp.allclose(out, ref, rtol=1e-4, atol=1e-4), (out, ref)

    print("KERNEL_OK")
</pallas_src>

<mosaic_0001>
module attributes {stable_mosaic.version = 11 : i64} {
  func.func @_examplar_loss_kernel(%arg0: i32, %arg1: memref<8x128xf32, #tpu.memory_space<vmem>>, %arg2: memref<8x128xf32, #tpu.memory_space<vmem>>) attributes {dimension_semantics = [#tpu.dimension_semantics<parallel>], iteration_bounds = array<i64: 1>, scalar_prefetch = 0 : i64, scratch_operands = 0 : i64, tpu.core_type = #tpu.core_type<tc>, window_params = [{pipeline_mode = #tpu.pipeline_mode<synchronous>, transform_indices = @transform_0, window_bounds = array<i64: 8, 128>}, {transform_indices = @transform_1, window_bounds = array<i64: 8, 128>}]} {
    %c0 = arith.constant 0 : index
    %c0_0 = arith.constant 0 : index
    %0 = vector.load %arg1[%c0, %c0_0] : memref<8x128xf32, #tpu.memory_space<vmem>>, vector<8x128xf32>
    %1 = arith.mulf %0, %0 : vector<8x128xf32>
    %cst = arith.constant dense<0.000000e+00> : vector<8xf32>
    %2 = vector.multi_reduction <add>, %1, %cst [1] : vector<8x128xf32> to vector<8xf32>
    %3 = vector.shape_cast %2 : vector<8xf32> to vector<8x1xf32>
    %4 = math.rsqrt %3 : vector<8x1xf32>
    %cst_1 = arith.constant 1.000000e+00 : f32
    %5 = vector.broadcast %cst_1 : f32 to vector<8x1xf32>
    %6 = arith.mulf %4, %5 : vector<8x1xf32>
    %7 = vector.broadcast %6 : vector<8x1xf32> to vector<8x128xf32>
    %8 = arith.mulf %0, %7 : vector<8x128xf32>
    %c8_i32 = arith.constant 8 : i32
    %9 = arith.muli %arg0, %c8_i32 : i32
    %10 = tpu.assume_multiple %9, 8 : i32
    %11 = arith.index_cast %10 : i32 to index
    %c0_2 = arith.constant 0 : index
    %12 = vector.load %arg1[%11, %c0_2] : memref<8x128xf32, #tpu.memory_space<vmem>>, vector<8x128xf32>
    %13 = arith.mulf %12, %12 : vector<8x128xf32>
    %cst_3 = arith.constant dense<0.000000e+00> : vector<8xf32>
    %14 = vector.multi_reduction <add>, %13, %cst_3 [1] : vector<8x128xf32> to vector<8xf32>
    %15 = vector.shape_cast %14 : vector<8xf32> to vector<8x1xf32>
    %16 = math.rsqrt %15 : vector<8x1xf32>
    %cst_4 = arith.constant 1.000000e+00 : f32
    %17 = vector.broadcast %cst_4 : f32 to vector<8x1xf32>
    %18 = arith.mulf %16, %17 : vector<8x1xf32>
    %19 = vector.broadcast %18 : vector<8x1xf32> to vector<8x128xf32>
    %20 = arith.mulf %12, %19 : vector<8x128xf32>
    %cst_5 = arith.constant dense<0.000000e+00> : vector<8x8xf32>
    %21 = tpu.matmul %20, %8, %cst_5 {dimension_numbers = #tpu.dot_dimension_numbers<[1], [1], [0], [0], [0, 0, 1, 0], [], []>} : vector<8x128xf32>, vector<8x128xf32>, vector<8x8xf32> -> vector<8x8xf32>
    %22 = tpu.iota {dimensions = array<i32: 0>} : vector<8x8xi32>
    %23 = vector.broadcast %10 : i32 to vector<8x8xi32>
    %24 = arith.addi %23, %22 : vector<8x8xi32>
    %25 = tpu.iota {dimensions = array<i32: 1>} : vector<8x8xi32>
    %26 = arith.cmpi eq, %24, %25 : vector<8x8xi32>
    %cst_6 = arith.constant 0.000000e+00 : f32
    %27 = vector.broadcast %cst_6 : f32 to vector<8x8xf32>
    %28 = arith.select %26, %27, %21 : vector<8x8xi1>, vector<8x8xf32>
    %cst_7 = arith.constant dense<0xFF800000> : vector<8xf32>
    %29 = vector.multi_reduction <maximumf>, %28, %cst_7 [1] : vector<8x8xf32> to vector<8xf32>
    %30 = vector.shape_cast %29 : vector<8xf32> to vector<8x1xf32>
    %31 = vector.broadcast %30 : vector<8x1xf32> to vector<8x8xf32>
    %32 = arith.subf %28, %31 : vector<8x8xf32>
    %33 = math.exp %32 : vector<8x8xf32>
    %cst_8 = arith.constant dense<0.000000e+00> : vector<8xf32>
    %34 = vector.multi_reduction <add>, %33, %cst_8 [1] : vector<8x8xf32> to vector<8xf32>
    %35 = vector.shape_cast %34 : vector<8xf32> to vector<8x1xf32>
    %36 = math.log %35 : vector<8x1xf32>
    %37 = arith.addf %30, %36 : vector<8x1xf32>
    %c4_i32 = arith.constant 4 : i32
    %38 = vector.broadcast %c4_i32 : i32 to vector<8x8xi32>
    %39 = arith.cmpi slt, %24, %38 : vector<8x8xi32>
    %c4_i32_9 = arith.constant 4 : i32
    %40 = vector.broadcast %c4_i32_9 : i32 to vector<8x8xi32>
    %41 = arith.addi %24, %40 : vector<8x8xi32>
    %c4_i32_10 = arith.constant 4 : i32
    %42 = vector.broadcast %c4_i32_10 : i32 to vector<8x8xi32>
    %43 = arith.subi %24, %42 : vector<8x8xi32>
    %44 = arith.select %39, %41, %43 : vector<8x8xi1>, vector<8x8xi32>
    %45 = arith.cmpi eq, %25, %44 : vector<8x8xi32>
    %cst_11 = arith.constant 0.000000e+00 : f32
    %46 = vector.broadcast %cst_11 : f32 to vector<8x8xf32>
    %47 = arith.select %45, %28, %46 : vector<8x8xi1>, vector<8x8xf32>
    %cst_12 = arith.constant dense<0.000000e+00> : vector<8xf32>
    %48 = vector.multi_reduction <add>, %47, %cst_12 [1] : vector<8x8xf32> to vector<8xf32>
    %49 = vector.shape_cast %48 : vector<8xf32> to vector<8x1xf32>
    %50 = arith.subf %49, %37 : vector<8x1xf32>
    %51 = vector.shape_cast %50 : vector<8x1xf32> to vector<1x8x1xf32>
    %cst_13 = arith.constant dense<0.000000e+00> : vector<1xf32>
    %52 = vector.multi_reduction <add>, %51, %cst_13 [1, 2] : vector<1x8x1xf32> to vector<1xf32>
    %53 = vector.shape_cast %52 : vector<1xf32> to vector<1x1x1xf32>
    %54 = vector.extract %53[0, 0, 0] : f32 from vector<1x1x1xf32>
    %55 = vector.broadcast %54 : f32 to vector<8x128xf32>
    %c0_14 = arith.constant 0 : index
    %c0_15 = arith.constant 0 : index
    %56 = vector.load %arg2[%c0_14, %c0_15] : memref<8x128xf32, #tpu.memory_space<vmem>>, vector<8x128xf32>
    tpu.vector_store %arg2[%c0_14, %c0_15], %55 {strides = array<i32>} : memref<8x128xf32, #tpu.memory_space<vmem>>, vector<8x128xf32>,
    return
  }
  func.func @transform_0(%arg0: i32) -> (i32, i32) {
    %c0_i32 = arith.constant 0 : i32
    %c0_i32_0 = arith.constant 0 : i32
    %c0_i32_1 = arith.constant 0 : i32
    return %c0_i32, %c0_i32_0 : i32, i32
  }
  func.func @transform_1(%arg0: i32) -> (i32, i32) {
    %c0_i32 = arith.constant 0 : i32
    %c0_i32_0 = arith.constant 0 : i32
    return %arg0, %c0_i32 : i32, i32
  }
}

</mosaic_0001>

<bundles_post_ra>
// kernel: tpu_custom_call.1
= control target key start
LH: loop header
LB: loop body
LE: loop exit
PB: predicated region body
PF: predicated region fallthrough
CT: control target
= control target key end

     0   :  { %6 = vsyncpa [#allocation3], 0  ;;  %s250_s0 = inlined_call_operand.hbm [shape: f32[8,128], index: 0, kind: input, shape index: {}]   ;;  %s251_s1 = inlined_call_operand.hbm [shape: f32[8,128], index: 1, kind: output, shape index: {}]  }
   0x1   :  { %7 = vsyncpa [#allocation4], 0  ;;  %s230_s6 = smov [#allocation2]  }
   0x2   :  { %s14_s7 = sshll.u32 %s230_s6, 4  ;;  %s15_s7 = int_to_ptr.vmem [resolvable:$true] %s14_s7 }
   0x3   :  { %s194_s8 = scalar_lea.vmem %s15_s7, 128  ;;  %p199_p1 = scmp.lt.s32.totalorder %s15_s7, %s15_s7 }
   0x4   :  { %p195_p0 = scmp.ne.s32.totalorder %s15_s7, %s194_s8  ;;  %p200_p2 = scmp.lt.s32.totalorder %s194_s8, %s194_s8 }
   0x6   :  { %p201_p3 = por %p200_p2, %p199_p1 }
   0x8   :  { %p202_p4 = pnand %p201_p3, %p195_p0 }
   0xa   :  { %205 = shalt.err (!%p202_p4)
}
   0xb   :  { %17 = dma.hbm_to_vmem [thread:$0]  %s250_s0, 128, %s15_s7, [#allocation3]  }
   0xc   :  { %226 = dma.done.wait [#allocation3], 128  }
   0xd   :  { %227 = vsyncadd [#allocation3], 4294967168  ;;  %v21_v0 = vld [vmem:[#allocation2] sm:$0xff]  ;;  %v231_v2 = vmov 0.0   ;;  %vm232_vm0 = vmmov 0   ;;  %v105_v9 = vlaneseq  ;;  %vm113_vm3 = vcmask 64512  }
   0xe   :  { %v22_v1 = vmul.f32 %v21_v0, %v21_v0  ;;  %167 = vmatprep.subr.mxu0 %v231_v2  ;;  %169 = vmatprep.mubr.msk.f32.mxu0 %vm232_vm0, %v231_v2  ;;  %vm136_vm5 = vcmask 7168   ;;  %s233_s0 = smov [#allocation5]  }
   0xf   :  { %v106_v10 = vshrl.u32 %v105_v9, 7  ;;  %v110_v13 = vand.u32 127, %v105_v9  ;;  %s155_s11 = sshll.u32 %s233_s0, 4  ;;  %s156_s11 = int_to_ptr.vmem [resolvable:$true] %s155_s11 }
  0x10   :  { %23 = vadd.xlane.f32.xlu0 %v22_v1  ;;  %s206_s13 = scalar_lea.vmem %s156_s11, 128  ;;  %p211_p6 = scmp.lt.s32.totalorder %s156_s11, %s156_s11 }
  0x11   :  { %v127_v11 = vadd.s32 4, %v106_v10  ;;  %v164_v12 = vadd.s32 4294967292, %v106_v10  ;;  %vm126_vm1 = vcmp.lt.s32.totalorder %v106_v10, 4  ;;  %vm111_vm2 = vcmp.eq.s32.totalorder %v106_v10, %v110_v13  ;;  %p207_p5 = scmp.ne.s32.totalorder %s156_s11, %s206_s13  ;;  %p212_p7 = scmp.lt.s32.totalorder %s206_s13, %s206_s13 }
  0x13   :  { %v129_v14 = vsel %vm126_vm1, %v127_v11, %v164_v12  ;;  %p213_p8 = por %p212_p7, %p211_p6 }
  0x14   :  { %31 = vadd.xlane.f32.xlu0 %v22_v1  ;;  %vm130_vm4 = vcmp.eq.s32.totalorder %v110_v13, %v129_v14 }
  0x15   :  { %p214_p9 = pnand %p213_p8, %p207_p5 }
  0x99   :  { %v24_v3 = vpop.xlane.xlu0 %23 }
  0x9a   :  { %178 = vrsqrt.f32 %v24_v3 }
  0x9d   :  { %v32_v4 = vpop.xlane.xlu0 %31 }
  0x9e   :  { %180 = vrsqrt.f32 %v32_v4 }
  0xa7   :  { %v179_v5 = vpop.eup %178 }
  0xa8   :  { %v26_v6 = vmul.f32 %v179_v5, %v21_v0 }
  0xaa   :  { %168 = vmatpush3.xpose.msra.mxu0 %v26_v6 }
  0xab   :  { %v181_v7 = vpop.eup %180 }
  0xac   :  { %v34_v8 = vmul.f32 %v181_v7, %v21_v0 }
  0xae   :  { %170 = vmatmul.mubr.f32.vlgmr.msra.gmra.mxu0 %v34_v8 }
 0x16e   :  { %v101_v15 = vpop.f32.mrf.mxu0 }
 0x16f   :  { %v112_v16 = vsel %vm111_vm2, 0.0, %v101_v15 }
 0x170   :  { %v171_v17 = vpop.f32.mrf.mxu0  ;;  %v114_v18 = vsel %vm113_vm3, %v112_v16, -inf  ;;  %v131_v19 = vsel %vm130_vm4, %v112_v16, 0.0 }
 0x171   :  { %115 = vmax.xlane.f32.xlu1 %v114_v18  ;;  %v132_v20 = vsel %vm113_vm3, %v131_v19, 0.0 }
 0x172   :  { %133 = vadd.xlane.f32.xlu0 %v132_v20 }
 0x1fa   :  { %v116_v21 = vpop.xlane.xlu1 %115 }
 0x1fb   :  { %v117_v22 = vsub.f32 %v112_v16, %v116_v21  ;;  %v134_v30 = vpop.xlane.xlu0 %133 }
 0x1fd   :  { %v118_v23 = vmul.f32 1.442695, %v117_v22 }
 0x1ff   :  { %182 = vpow2.f32 %v118_v23 }
 0x20c   :  { %v183_v24 = vpop.eup %182 }
 0x20d   :  { %v120_v25 = vsel %vm113_vm3, %v183_v24, 0.0 }
 0x20e   :  { %121 = vadd.xlane.f32.xlu1 %v120_v25 }
 0x297   :  { %v122_v26 = vpop.xlane.xlu1 %121 }
 0x298   :  { %184 = vlog2.f32 %v122_v26 }
 0x2a5   :  { %v185_v27 = vpop.eup %184 }
 0x2a6   :  { %v124_v28 = vmul.f32 0.6931472, %v185_v27 }
 0x2a8   :  { %v125_v29 = vadd.f32 %v124_v28, %v116_v21 }
 0x2aa   :  { %v135_v31 = vsub.f32 %v134_v30, %v125_v29 }
 0x2ac   :  { %v137_v32 = vsel %vm136_vm5, %v135_v31, 0.0 }
 0x2ad   :  { %138 = vadd.xlane.f32.xlu1 %v137_v32 }
 0x336   :  { %v139_v33 = vpop.xlane.xlu1 %138 }
 0x337   :  { %v140_v34 = vrot.slane %v139_v33, 4 }
 0x339   :  { %v141_v35 = vadd.f32 %v140_v34, %v139_v33 }
 0x33b   :  { %v142_v36 = vrot.slane %v141_v35, 2 }
 0x33d   :  { %v143_v37 = vadd.f32 %v142_v36, %v141_v35 }
 0x33f   :  { %v144_v38 = vrot.slane %v143_v37, 1 }
 0x341   :  { %v145_v39 = vadd.f32 %v144_v38, %v143_v37 }
 0x343   :  { %172 = vpush %v145_v39 }
 0x374   :  { %s173_s12 = spop %172 }
 0x375   :  { %v147_v40 = vstv %s173_s12 }
 0x376   :  { %148 = vst [vmem:[#allocation5] sm:$0xff] %v147_v40 }
 0x377   :  { %217 = shalt.err (!%p214_p9)
}
 0x378   :  { %158 = dma.vmem_to_hbm [thread:$0]  %s156_s11, 128, %s251_s1, [#allocation4]  }
 0x379   :  { %228 = dma.done.wait [#allocation4], 128  }
 0x37a   :  { %229 = vsyncadd [#allocation4], 4294967168 }
 0x37b   :  { %162 = vsyncpa [#allocation3], 1 }
 0x37c   :  { %163 = vsyncpa [#allocation4], 1 }

</bundles_post_ra>
